<compile_context>
chip_gen: v6e
topology: v6e:2x2x1
jax: 0.10.0
libtpu: 0.0.40
codegen_flags: <defaults>
</compile_context>

<pallas_src>
import math

import jax
import jax.numpy as jnp
from jax.experimental import pallas as pl
from jax.experimental.pallas import tpu as pltpu

_EPS = 1e-12  # F.normalize default eps


def _cdiv(a, b):
    return (a + b - 1) // b


def _round_up(n, m):
    return _cdiv(n, m) * m


def _tpu_vmem_bytes():
    """Physical per-core VMEM, with a v7x-safe fallback."""
    try:
        info = pltpu.get_tpu_info()
        v = getattr(info, "vmem_capacity_bytes", None)
        if v:
            return int(v)
    except Exception:
        pass
    return 64 * 1024 * 1024  # conservative: v7x per-TensorCore VMEM


def _choose_tl(L, C, budget_elems, batch, min_steps=4):
    """Lane-axis tile size.

    - L <= 128: one full-extent lane block (no tiling, no partial blocks).
    - else: largest multiple of 128 that (a) fits the per-block element
      budget, (b) does not exceed ceil(L/128)*128, and (c) leaves the grid
      with >= `min_steps` total steps so v7x's two TensorCores both get work.
    """
    if L <= 128:
        return L
    tl = max(128, (budget_elems // max(C, 1)) // 128 * 128)
    tl = min(tl, _round_up(L, 128))
    lane_steps_wanted = _cdiv(min_steps, max(batch, 1))
    if lane_steps_wanted > 1:
        tl = min(tl, max(128, _round_up(_cdiv(L, lane_steps_wanted), 128)))
    return tl


def _rmsnorm_kernel(x_ref, g_ref, o_ref):
    # x_ref: (1, C, TL), g_ref: (1, C, 1), o_ref: (1, C, TL)
    x = x_ref[...]                       # native dtype (no blanket f32 upcast)
    c = x.shape[1]

    # Hoisted gain: one tiny (1, C, 1) f32 multiply per grid step.
    scale = g_ref[...].astype(jnp.float32) * math.sqrt(float(c))

    # Sum of squares over the channel (sublane) axis, accumulated in f32.
    xx = x * x
    if xx.dtype != jnp.float32:
        xx = xx.astype(jnp.float32)
    sq = jnp.sum(xx, axis=1, keepdims=True)                    # (1, 1, TL)

    # rsqrt(max(sq, eps^2)) == 1 / max(||x||, eps) since sq >= 0.  EUP op,
    # computed TL times per block instead of C*TL divides.
    inv = jax.lax.rsqrt(jnp.maximum(sq, _EPS * _EPS))          # (1, 1, TL)

    if x.dtype == jnp.float32:
        o_ref[...] = ((x * inv) * scale).astype(o_ref.dtype)
    else:
        # Low-precision I/O: keep the broadcast multiplies in the native dtype
        # (packed vregs) — avoids full-block f32 temporaries / extra VALU work.
        o_ref[...] = ((x * inv.astype(x.dtype))
                      * scale.astype(x.dtype)).astype(o_ref.dtype)


def rms_norm(x, g):
    """x: (B, C, L), g: (1, C, 1)  ->  (B, C, L)"""
    B, C, L = x.shape
    assert g.shape == (1, C, 1)
    itemsize = jnp.dtype(x.dtype).itemsize

    phys_vmem = _tpu_vmem_bytes()
    # Scoped VMEM limit: ~96 MiB on v5e/v6e (128 MiB physical), ~48 MiB on v7x.
    vmem_limit = int(min(3 * phys_vmem // 4, 96 * 1024 * 1024))

    # Per-block element budget: 2x double-buffered in + out blocks at the I/O
    # dtype plus ~3 full-block f32 temporaries must fit in ~80% of the limit;
    # also cap the in-block bytes (~4 MiB v5e/v6e, ~2.5 MiB v7x) — beyond that
    # the kernel is already at the HBM roofline and bigger tiles only cost
    # grid-level parallelism.
    per_elem_scratch = 4 * itemsize + 3 * 4
    fit_elems = (4 * vmem_limit // 5) // per_elem_scratch
    in_block_cap_bytes = 4 * 2**20 if phys_vmem > 64 * 2**20 else 5 * 2**19
    budget_elems = max(128, min(fit_elems, in_block_cap_bytes // itemsize))

    TL = _choose_tl(L, C, budget_elems, B)
    grid = (B, _cdiv(L, TL))

    out = pl.pallas_call(
        _rmsnorm_kernel,
        out_shape=jax.ShapeDtypeStruct((B, C, L), x.dtype),
        grid_spec=pltpu.PrefetchScalarGridSpec(
            num_scalar_prefetch=0,
            grid=grid,
            in_specs=[
                pl.BlockSpec((1, C, TL), lambda b, l: (b, 0, l)),
                pl.BlockSpec((1, C, 1), lambda b, l: (0, 0, 0)),
            ],
            out_specs=pl.BlockSpec((1, C, TL), lambda b, l: (b, 0, l)),
        ),
        compiler_params=pltpu.CompilerParams(
            dimension_semantics=("parallel", "parallel"),
            vmem_limit_bytes=vmem_limit,
        ),
        cost_estimate=pl.CostEstimate(
            # square + channel-sum + rsqrt-scale muls (~5 flops/elem), 1R + 1W.
            flops=int(5 * B * C * L),
            transcendentals=int(B * L),
            bytes_accessed=int(2 * B * C * L * itemsize
                               + C * jnp.dtype(g.dtype).itemsize),
        ),
    )(x, g)
    return out


def _reference(x, g):
    x32 = x.astype(jnp.float32)
    sq_sum = jnp.sum(x32 * x32, axis=1, keepdims=True)
    denom = jnp.maximum(jnp.sqrt(sq_sum), _EPS)
    return ((x32 / denom) * g.astype(jnp.float32)
            * math.sqrt(x.shape[1])).astype(x.dtype)


if __name__ == "__main__":
    key = jax.random.PRNGKey(0)
    k1, k2, k3, k4 = jax.random.split(key, 4)

    # --- Test 1: module-default shapes, g = ones (matches nn.Parameter init).
    B, C, L = 2, 4, 16
    x = jax.random.normal(k1, (B, C, L), dtype=jnp.float32)
    g = jnp.ones((1, C, 1), dtype=jnp.float32)
    out = jax.block_until_ready(rms_norm(x, g))
    ref = _reference(x, g)
    assert out.shape == (B, C, L)
    assert jnp.allclose(out, ref, atol=1e-5, rtol=1e-5), "f32 small mismatch"

    # --- Test 2: ragged length (L % 128 != 0, L > 128) exercises the
    # partial-last-block path with a non-trivial gain.
    B2, C2, L2 = 2, 8, 200
    x2 = jax.random.normal(k2, (B2, C2, L2), dtype=jnp.float32)
    g2 = 1.0 + 0.1 * jax.random.normal(k3, (1, C2, 1), dtype=jnp.float32)
    out2 = jax.block_until_ready(rms_norm(x2, g2))
    ref2 = _reference(x2, g2)
    assert out2.shape == (B2, C2, L2)
    assert jnp.allclose(out2, ref2, atol=1e-5, rtol=1e-5), "f32 ragged mismatch"

    # --- Test 3: bf16 I/O path (native-dtype elementwise math).
    x3 = jax.random.normal(k4, (B, C, L), dtype=jnp.float32).astype(jnp.bfloat16)
    g3 = jnp.ones((1, C, 1), dtype=jnp.bfloat16)
    out3 = jax.block_until_ready(rms_norm(x3, g3))
    ref3 = _reference(x3, g3)
    assert jnp.allclose(out3.astype(jnp.float32), ref3.astype(jnp.float32),
                        atol=5e-2, rtol=5e-2), "bf16 mismatch"

    print("KERNEL_OK")
</pallas_src>

<mosaic_0001>
module attributes {stable_mosaic.version = 11 : i64} {
  func.func @_rmsnorm_kernel(%arg0: i32, %arg1: i32, %arg2: memref<1x4x16xf32, #tpu.memory_space<vmem>>, %arg3: memref<1x4x1xf32, #tpu.memory_space<vmem>>, %arg4: memref<1x4x16xf32, #tpu.memory_space<vmem>>) attributes {dimension_semantics = [#tpu.dimension_semantics<parallel>, #tpu.dimension_semantics<parallel>], iteration_bounds = array<i64: 2, 1>, scalar_prefetch = 0 : i64, scratch_operands = 0 : i64, tpu.core_type = #tpu.core_type<tc>, window_params = [{transform_indices = @transform_0, window_bounds = array<i64: 1, 4, 16>}, {pipeline_mode = #tpu.pipeline_mode<synchronous>, transform_indices = @transform_1, window_bounds = array<i64: 1, 4, 1>}, {transform_indices = @transform_2, window_bounds = array<i64: 1, 4, 16>}]} {
    %c0 = arith.constant 0 : index
    %c0_0 = arith.constant 0 : index
    %c0_1 = arith.constant 0 : index
    %0 = vector.load %arg2[%c0, %c0_0, %c0_1] : memref<1x4x16xf32, #tpu.memory_space<vmem>>, vector<1x4x16xf32>
    %c0_2 = arith.constant 0 : index
    %c0_3 = arith.constant 0 : index
    %c0_4 = arith.constant 0 : index
    %1 = vector.load %arg3[%c0_2, %c0_3, %c0_4] : memref<1x4x1xf32, #tpu.memory_space<vmem>>, vector<1x4x1xf32>
    %cst = arith.constant 2.000000e+00 : f32
    %2 = vector.broadcast %cst : f32 to vector<1x4x1xf32>
    %3 = arith.mulf %1, %2 : vector<1x4x1xf32>
    %4 = arith.mulf %0, %0 : vector<1x4x16xf32>
    %cst_5 = arith.constant dense<0.000000e+00> : vector<1x16xf32>
    %5 = vector.multi_reduction <add>, %4, %cst_5 [1] : vector<1x4x16xf32> to vector<1x16xf32>
    %6 = vector.shape_cast %5 : vector<1x16xf32> to vector<1x1x16xf32>
    %cst_6 = arith.constant 1.000000e-24 : f32
    %7 = vector.broadcast %cst_6 : f32 to vector<1x1x16xf32>
    %8 = arith.maximumf %6, %7 : vector<1x1x16xf32>
    %9 = math.rsqrt %8 : vector<1x1x16xf32>
    %10 = vector.broadcast %9 : vector<1x1x16xf32> to vector<1x4x16xf32>
    %11 = arith.mulf %0, %10 : vector<1x4x16xf32>
    %12 = vector.broadcast %3 : vector<1x4x1xf32> to vector<1x4x16xf32>
    %13 = arith.mulf %11, %12 : vector<1x4x16xf32>
    %c0_7 = arith.constant 0 : index
    %c0_8 = arith.constant 0 : index
    %c0_9 = arith.constant 0 : index
    %14 = vector.load %arg4[%c0_7, %c0_8, %c0_9] : memref<1x4x16xf32, #tpu.memory_space<vmem>>, vector<1x4x16xf32>
    tpu.vector_store %arg4[%c0_7, %c0_8, %c0_9], %13 {strides = array<i32>} : memref<1x4x16xf32, #tpu.memory_space<vmem>>, vector<1x4x16xf32>,
    return
  }
  func.func @transform_0(%arg0: i32, %arg1: i32) -> (i32, i32, i32) {
    %c0_i32 = arith.constant 0 : i32
    %c0_i32_0 = arith.constant 0 : i32
    return %arg0, %c0_i32, %arg1 : i32, i32, i32
  }
  func.func @transform_1(%arg0: i32, %arg1: i32) -> (i32, i32, i32) {
    %c0_i32 = arith.constant 0 : i32
    %c0_i32_0 = arith.constant 0 : i32
    %c0_i32_1 = arith.constant 0 : i32
    %c0_i32_2 = arith.constant 0 : i32
    return %c0_i32, %c0_i32_0, %c0_i32_1 : i32, i32, i32
  }
  func.func @transform_2(%arg0: i32, %arg1: i32) -> (i32, i32, i32) {
    %c0_i32 = arith.constant 0 : i32
    %c0_i32_0 = arith.constant 0 : i32
    return %arg0, %c0_i32, %arg1 : i32, i32, i32
  }
}

</mosaic_0001>

<bundles_post_ra>
// kernel: tpu_custom_call.1
= control target key start
LH: loop header
LB: loop body
LE: loop exit
PB: predicated region body
PF: predicated region fallthrough
CT: control target
= control target key end

     0   :  { %7 = vsyncpa [#allocation3], 0  ;;  %s639_s0 = inlined_call_operand.hbm [shape: f32[2,4,16], index: 0, kind: input, shape index: {}]   ;;  %s640_s1 = inlined_call_operand.vmem [shape: f32[1,4,1], index: 1, kind: input, shape index: {}]   ;;  %s641_s2 = inlined_call_operand.hbm [shape: f32[2,4,16], index: 2, kind: output, shape index: {}]  }
   0x1   :  { %9 = vsyncpa [#allocation3 + $0x1], 0 }
   0x2   :  { %10 = vsyncpa [#allocation4], 0 }
   0x3   :  { %12 = vsyncpa [#allocation4 + $0x1], 0  ;;  %s500_s9 = smov 0   ;;  %s502_s10 = smov 0  }
   0x4   :  { %s504_s11 = smov 0   ;;  %s506_s12 = smov 0  }
   0x5   :  { %s508_s13 = smov 0   ;;  %s510_s14 = smov 0  }
   0x6 LB: > { %s293_s15 = sadd.s32 4294967295, %s480_s14   ;;  %s294_s16 = sadd.s32 4294967294, %s480_s14   ;;  %s480_s14 = sphi %s510_s14, %s18_s14   ;;  %s476_s13 = sphi %s508_s13, %s653_s13   ;;  %s472_s12 = sphi %s506_s12, %s652_s12   ;;  %s468_s11 = sphi %s504_s11, %s651_s11   ;;  %s464_s10 = sphi %s502_s10, %s650_s10   ;;  %s460_s9 = sphi %s500_s9, %s649_s9  }
   0x7   : > { %s30_s17 = sadd.s32 1, %s476_s13  ;;  %s39_s18 = sadd.s32 1, %s468_s11 }
   0x8   : > { %p32_p0 = scmp.ge.s32.totalorder %s30_s17, 2  ;;  %p46_p1 = scmp.ne.s32.totalorder %s468_s11, %s464_s10 }
   0x9   : > { %p47_p2 = scmp.eq.s32.totalorder %s480_s14, 0  ;;  %p52_p3 = scmp.ne.s32.totalorder %s464_s10, %s460_s9 }
   0xa   : > { %s655_s17 = smov (%p32_p0, %s30_s17), 0  ;;  %p53_p5 = scmp.eq.s32.totalorder %s293_s15, 0 }
   0xb   : > { %p541_p4 = por %p47_p2, %p46_p1  ;;  %s34_s20 = ssub.s32 %s476_s13, %s655_s17 }
   0xc   : > { %p99_p6 = scmp.eq.s32.totalorder %s293_s15, 1  ;;  %p37_p7 = scmp.eq.s32.totalorder %s34_s20, 0 }
   0xd   : > { %p547_p8 = por %p53_p5, %p52_p3  ;;  %p105_p10 = scmp.eq.s32.totalorder %s294_s16, 1 }
   0xe   : > { %p551_p9 = por %p99_p6, %p46_p1  ;;  %p318_p13 = scmp.lt.s32.totalorder %s480_s14, 2 }
   0xf   : > { %s556_s23 = scalar_select %p37_p7, %s468_s11, %s39_s18  }
  0x10   : > { %p558_p11 = por %p105_p10, %p52_p3  ;;  %s128_s25 = sand.u32 1, %s468_s11  }
  0x11   : > { %s297_s26 = sshll.u32 %s128_s25, 2  ;;  %s298_s27 = sshll.u32 %s476_s13, 6 }
  0x12   : > { %s645_s24 = scalar_select %p558_p11, 1, 0 }
  0x13   : > { %s138_s30 = scalar_lea.hbm %s639_s0, %s298_s27  ;;  %s132_s3 = scalar_lea.vmem [#allocation2], %s297_s26 }
  0x14   : > { %s140_s4 = sshll.u32 %s132_s3, 4  ;;  %p571_p0 = pnand %p318_p13, %p541_p4  ;;  %s141_s4 = int_to_ptr.vmem [resolvable:$true] %s140_s4 }
  0x15   : > { %p299_p1 = scmp.ge.s32.totalorder %s480_s14, 1  ;;  %p145_p2 = scmp.lt.s32.totalorder %s480_s14, 3 }
  0x16   : > { %s129_s6 = scalar_lea.sflag [#allocation3], %s128_s25  ;;  %p374_p3 = pneg %p571_p0 }
  0x17   : > { %s385_s7 = scalar_lea.vmem %s141_s4, 64  ;;  %s482_s8 = smov [#allocation2]  }
  0x18   : > { %p386_p5 = scmp.ne.s32.totalorder %s141_s4, %s385_s7  ;;  %s390_s15 = sshll.u32 %s482_s8, 4  ;;  %s391_s15 = int_to_ptr.vmem [resolvable:$false] %s390_s15 }
  0x19   : > { %s392_s16 = scalar_lea.vmem %s391_s15, 128  ;;  %p393_p10 = scmp.lt.s32.totalorder %s141_s4, %s391_s15 }
  0x1a   : > { %p388_p6 = pnand %p386_p5, %p374_p3  ;;  %p394_p12 = scmp.lt.s32.totalorder %s392_s16, %s385_s7 }
  0x1c   : > { %p389_p7 = pneg %p388_p6  ;;  %p395_p4 = por %p394_p12, %p393_p10 }
  0x1e   : > { %p396_p13 = pnand %p395_p4, %p389_p7 }
  0x20   : > { %399 = shalt.err (!%p396_p13)
}
  0x21   : > { %313 = dma.hbm_to_vmem [thread:$0]  (!%p571_p0), %s138_s30, 64, %s141_s4, %s129_s6  }
  0x22   : > { %p146_p11 = pnand %p299_p1, %p145_p2 }
  0x23   : > { %s586_s18 = sand.u32 (!%p146_p11), 1, %s464_s10  }
  0x24   : > { %149 = sbr.rel (%p146_p11) target bundleno = 184 (0xb8), region = 28  ;;  %s300_s19 = sshll.u32 (!%p146_p11), %s586_s18, 2 }
  0x25   : > { %s152_s20 = scalar_lea.sflag (!%p146_p11), [#allocation3], %s586_s18  ;;  %s155_s25 = scalar_lea.vmem (!%p146_p11), [#allocation2], %s300_s19 }
  0x29   : > { %451 = dma.done.wait (%p547_p8), %s152_s20, 64  }
  0x2a   : > { %453 = vsyncadd (%p547_p8), %s152_s20, 4294967232  ;;  %v483_v0 = vmov 0   ;;  %v177_v1 = vld [vmem:[%s640_s1] sm:$0xf]  ;;  %vm180_vm0 = vcmask 125952   ;;  %s303_s21 = sshll.u32 %s472_s12, 6 }
  0x2b   : > { %369 = vset.pattern.permute.xlu0 %v483_v0  ;;  %v178_v2 = vmul.f32 2.0, %v177_v1  ;;  %v176_v3 = vld [vmem:[%s155_s25] sm:$0xf]  ;;  %s175_s28 = scalar_lea.vmem [#allocation5], %s300_s19  ;;  %s211_s4 = scalar_lea.hbm %s641_s2, %s303_s21 }
  0x2c   : > { %v179_v4 = vmul.f32 %v176_v3, %v176_v3  ;;  %s213_s29 = sshll.u32 %s175_s28, 4  ;;  %s199_s5 = scalar_lea.sflag [#allocation4], %s586_s18  ;;  %s214_s29 = int_to_ptr.vmem [resolvable:$true] %s213_s29 }
  0x2d   : > { %193 = vperm.xlu0 %369, %v178_v2   ;;  %s400_s6 = scalar_lea.vmem %s214_s29, 64  ;;  %s484_s7 = smov [#allocation5]  }
  0x2e   : > { %v181_v5 = vsel %vm180_vm0, %v179_v4, 0.0  ;;  %p401_p8 = scmp.ne.s32.totalorder %s214_s29, %s400_s6  ;;  %s404_s8 = sshll.u32 %s484_s7, 4  ;;  %s405_s8 = int_to_ptr.vmem [resolvable:$false] %s404_s8 }
  0x2f   : > { %v182_v6 = vrot.slane %v181_v5, 4  ;;  %s406_s12 = scalar_lea.vmem %s405_s8, 128  ;;  %p407_p0 = scmp.lt.s32.totalorder %s214_s29, %s405_s8 }
  0x30   : > { %p402_p11 = pnand %p401_p8, %p551_p9  ;;  %p408_p1 = scmp.lt.s32.totalorder %s406_s12, %s400_s6 }
  0x31   : > { %v183_v7 = vadd.f32 %v182_v6, %v181_v5 }
  0x32   : > { %p403_p12 = pneg %p402_p11  ;;  %p409_p2 = por %p408_p1, %p407_p0 }
  0x33   : > { %v184_v8 = vrot.slane %v183_v7, 2 }
  0x34   : > { %p410_p3 = pnand %p409_p2, %p403_p12 }
  0x35   : > { %v185_v9 = vadd.f32 %v184_v8, %v183_v7 }
  0x37   : > { %v186_v10 = vrot.slane %v185_v9, 1 }
  0x39   : > { %v187_v11 = vadd.f32 %v186_v10, %v185_v9 }
  0x3b   : > { %v188_v12 = vmax.f32 %v187_v11, 1e-24 }
  0x3d   : > { %370 = vrsqrt.f32 %v188_v12 }
  0x4a   : > { %v371_v13 = vpop.eup %370 }
  0x4b   : > { %v190_v14 = vmul.f32 %v371_v13, %v176_v3 }
  0xa8   : > { %v194_v15 = vpop.permute.xlu0 %193 }
  0xa9   : > { %v196_v16 = vmul.f32 %v194_v15, %v190_v14 }
  0xab   : > { %197 = vst.msk [vmem:[%s175_s28] sm:$0xf] %vm180_vm0, %v196_v16 }
  0xac   : > { %413 = shalt.err (!%p410_p3)
}
  0xad   : > { %s414_s15 = scalar_lea.hbm %s211_s4, 64  ;;  %s418_s19 = scalar_lea.hbm %s641_s2, 128 }
  0xae   : > { %p415_p5 = scmp.ne.s32.totalorder %s211_s4, %s414_s15  ;;  %p419_p10 = scmp.lt.s32.totalorder %s211_s4, %s641_s2 }
  0xaf   : > { %p420_p4 = scmp.lt.s32.totalorder %s418_s19, %s414_s15 }
  0xb0   : > { %p416_p6 = pnand %p415_p5, %p551_p9 }
  0xb1   : > { %p421_p13 = por %p420_p4, %p419_p10 }
  0xb2   : > { %p417_p7 = pneg %p416_p6 }
  0xb4   : > { %p422_p8 = pnand %p421_p13, %p417_p7 }
  0xb6   : > { %425 = shalt.err (!%p422_p8)
}
  0xb7   : > { %308 = dma.vmem_to_hbm [thread:$0]  (%p551_p9), %s214_s29, 64, %s211_s4, %s199_s5  }
  0xb8 PF: > { %s225_s26 = sand.u32 1, %s460_s9   ;;  %p647_p11 = scmp.ne.s32.totalorder %s645_s24, 0 }
  0xb9   : > { %p648_p12 = scmp.ge.s32.totalorder %s480_s14, 2  ;;  %s226_s27 = scalar_lea.sflag [#allocation4], %s225_s26 }
  0xbb   : > { %p315_p0 = pnand %p648_p12, %p647_p11 }
  0xbd   : > { %p316_p1 = pneg %p315_p0 }
  0xbf   : > { %455 = dma.done.wait (%p316_p1), %s226_s27, 64  }
  0xc0   : > { %457 = vsyncadd (%p316_p1), %s226_s27, 4294967232  ;;  %s18_s14 = sadd.s32 1, %s480_s14   ;;  %s649_s9 = smov %s464_s10 }
  0xc1   : > { %p15_p2 = scmp.ge.s32.totalorder %s18_s14, 4   ;;  %s650_s10 = smov %s468_s11 }
  0xc2   : > { %s651_s11 = smov %s556_s23  ;;  %s652_s12 = smov %s476_s13 }
  0xc3   : > { %s653_s13 = smov %s655_s17  ;;  %17 = sbr.rel (!%p15_p2) target bundleno = 6 (0x6), region = 73 }
  0xc8   :  { %231 = vsyncpa [#allocation3], 1 }
  0xc9   :  { %233 = vsyncpa [#allocation3 + $0x1], 1 }
  0xca   :  { %234 = vsyncpa [#allocation4], 1 }
  0xcb   :  { %236 = vsyncpa [#allocation4 + $0x1], 1 }

</bundles_post_ra>
